<compile_context>
chip_gen: v5e
topology: v5e:2x2
jax: 0.10.0
libtpu: 0.0.40
codegen_flags: <defaults>
</compile_context>

<pallas_src>
import functools

import jax
import jax.numpy as jnp
from jax.experimental import pallas as pl
from jax.experimental.pallas import tpu as pltpu


# ---------------------------------------------------------------------------
# helpers
# ---------------------------------------------------------------------------
def _round_up(x, m):
    return ((x + m - 1) // m) * m


_VMEM_TILE_BUDGET = 20 * 1024 * 1024   # conservative; fits all three chips' scoped VMEM


def _select_tiles(B, out_p, in_p, itemsize):
    """Pick (B_p, tm, tn, tk): choose tiles first, then pad batch up to the tile."""
    # --- batch tile: small batches can't fill the MXU anyway; large batches get
    #     128/256-row tiles instead of degrading to tm=16/32.
    if B <= 64:
        B_p = _round_up(B, 16)          # bf16 sublane-packing granularity
        tm = B_p
    else:
        tm = 256 if B >= 192 else 128
        B_p = _round_up(B, tm)

    # --- output tile (lane-dense; out_p is already a multiple of 128)
    tn = next(c for c in (512, 256, 128) if out_p % c == 0)

    # --- guarantee >= 2 parallel blocks when possible (v7x has 2 TensorCores)
    if (B_p // tm) * (out_p // tn) < 2:
        if tn % 256 == 0:
            tn //= 2
        elif tm >= 32 and (tm // 2) % 16 == 0:
            tm //= 2

    # --- reduction tile: as deep as the VMEM budget allows (cuts accumulator RMW
    #     traffic and per-step pipeline overhead)
    tk = 128
    for cand in (in_p, 2048, 1024, 512, 256, 128):
        if cand > in_p or in_p % cand != 0:
            continue
        vmem = (2 * 2 * tm * cand * itemsize      # xr, xi blocks, double-buffered
                + 2 * 2 * cand * tn * itemsize    # stacked [Wr.T, Wi.T], double-buffered
                + 2 * tm * cand * itemsize        # in-kernel [xr; xi] slab scratch
                + 2 * 2 * tm * tn * 4             # resident f32 real/imag out blocks (x2 bufs)
                + 2 * 2 * tm * tn * 4)            # pr/pi f32 matmul intermediates
        if vmem <= _VMEM_TILE_BUDGET:
            tk = cand
            break
    return B_p, tm, tn, tk


# ---------------------------------------------------------------------------
# kernel
# ---------------------------------------------------------------------------
def _complex_linear_kernel(xr_ref, xi_ref, w_ref, br_ref, bi_ref,
                           real_ref, imag_ref, xs_ref):
    k = pl.program_id(2)
    tm = real_ref.shape[0]

    @pl.when(k == 0)
    def _init():
        # Fold the bias straight into the resident output accumulators.
        real_ref[...] = jnp.broadcast_to(br_ref[...], real_ref.shape)
        imag_ref[...] = jnp.broadcast_to(bi_ref[...], imag_ref.shape)

    # Assemble the M-stacked [xr ; xi] LHS slab in VMEM (vst/vld slots, hidden under
    # the MXU) so each grid step pushes Wr.T and Wi.T through the MXU only once each.
    xs_ref[:tm, :] = xr_ref[...]
    xs_ref[tm:, :] = xi_ref[...]
    x2 = xs_ref[...]

    # Consume pr fully before producing pi: only one (2*tm, tn) f32 intermediate is
    # live at a time.
    pr = jnp.dot(x2, w_ref[0], preferred_element_type=jnp.float32)   # [xr@Wr.T ; xi@Wr.T]
    real_ref[...] += pr[:tm, :]
    imag_ref[...] += pr[tm:, :]

    pi = jnp.dot(x2, w_ref[1], preferred_element_type=jnp.float32)   # [xr@Wi.T ; xi@Wi.T]
    real_ref[...] -= pi[tm:, :]
    imag_ref[...] += pi[:tm, :]


# ---------------------------------------------------------------------------
# parameter preparation (hoisted out of the per-call hot path)
# ---------------------------------------------------------------------------
def prepare_params(wr, wi, br, bi, compute_dtype=jnp.bfloat16):
    """wr/wi: (out, in) PyTorch-style.  br/bi: (out,).

    Returns (ws, b_real, b_imag) where
      ws      : (2, in_p, out_p) stacked, pre-transposed, padded weights
      b_real  : (1, out_p) = br - bi  (padded, f32)
      b_imag  : (1, out_p) = br + bi  (padded, f32)
    """
    out_f, in_f = wr.shape
    out_p = _round_up(out_f, 128)
    in_p = _round_up(in_f, 128)

    ws = jnp.stack([wr.T, wi.T], axis=0).astype(compute_dtype)      # (2, in, out)
    ws = jnp.pad(ws, ((0, 0), (0, in_p - in_f), (0, out_p - out_f)))

    b_real = jnp.pad((br - bi).astype(jnp.float32), (0, out_p - out_f)).reshape(1, out_p)
    b_imag = jnp.pad((br + bi).astype(jnp.float32), (0, out_p - out_f)).reshape(1, out_p)
    return ws, b_real, b_imag


# ---------------------------------------------------------------------------
# wrappers
# ---------------------------------------------------------------------------
@functools.partial(jax.jit, static_argnames=("out_features",))
def complex_linear_planar(xr, xi, ws, b_real, b_imag, *, out_features):
    """Planar entry point: xr/xi (B, in) real planes -> (real, imag) f32 planes.

    Lets callers that keep separate real/imag planes skip the complex64 interleave
    read+write pass entirely.
    """
    compute_dtype = ws.dtype
    _, in_p, out_p = ws.shape
    B, in_f = xr.shape
    itemsize = jnp.dtype(compute_dtype).itemsize

    B_p, tm, tn, tk = _select_tiles(B, out_p, in_p, itemsize)

    # Zero-pad (no-op when already aligned); no HBM repack of a stacked activation.
    xr = jnp.pad(xr.astype(compute_dtype), ((0, B_p - B), (0, in_p - in_f)))
    xi = jnp.pad(xi.astype(compute_dtype), ((0, B_p - B), (0, in_p - in_f)))

    grid = (B_p // tm, out_p // tn, in_p // tk)

    cost = pl.CostEstimate(
        flops=8 * B_p * in_p * out_p,
        transcendentals=0,
        bytes_accessed=(2 * B_p * in_p * itemsize + ws.size * itemsize
                        + (b_real.size + b_imag.size) * 4
                        + 2 * B_p * out_p * 4),
    )

    real_p, imag_p = pl.pallas_call(
        _complex_linear_kernel,
        out_shape=(
            jax.ShapeDtypeStruct((B_p, out_p), jnp.float32),
            jax.ShapeDtypeStruct((B_p, out_p), jnp.float32),
        ),
        grid=grid,
        in_specs=[
            pl.BlockSpec((tm, tk), lambda i, j, k: (i, k)),        # xr
            pl.BlockSpec((tm, tk), lambda i, j, k: (i, k)),        # xi
            pl.BlockSpec((2, tk, tn), lambda i, j, k: (0, k, j)),  # [Wr.T, Wi.T]
            pl.BlockSpec((1, tn), lambda i, j, k: (0, j)),         # br - bi
            pl.BlockSpec((1, tn), lambda i, j, k: (0, j)),         # br + bi
        ],
        out_specs=(
            pl.BlockSpec((tm, tn), lambda i, j, k: (i, j)),
            pl.BlockSpec((tm, tn), lambda i, j, k: (i, j)),
        ),
        scratch_shapes=[pltpu.VMEM((2 * tm, tk), compute_dtype)],
        compiler_params=pltpu.CompilerParams(
            dimension_semantics=("parallel", "parallel", "arbitrary"),
            vmem_limit_bytes=32 * 1024 * 1024,
        ),
        cost_estimate=cost,
    )(xr, xi, ws, b_real, b_imag)

    return real_p[:B, :out_features], imag_p[:B, :out_features]


@functools.partial(jax.jit, static_argnames=("out_features",))
def complex_linear(x, ws, b_real, b_imag, *, out_features):
    """x: complex64 (B, in). Returns complex64 (B, out_features), matching
    ComplexLinear.forward."""
    real, imag = complex_linear_planar(jnp.real(x), jnp.imag(x), ws, b_real, b_imag,
                                       out_features=out_features)
    # TODO(synk): downstream consumers that accept separate real/imag planes should call
    # complex_linear_planar directly and skip this interleaving pass.
    return jax.lax.complex(real, imag)


# ---------------------------------------------------------------------------
# init mirroring the PyTorch module's __init__
# ---------------------------------------------------------------------------
def init_params(key, in_features, out_features):
    """Weights: kaiming_normal_(mode='fan_out', nonlinearity='relu') -> N(0, sqrt(2/out)).
    Biases: nn.Linear default -> U(-1/sqrt(in), 1/sqrt(in))."""
    k_wr, k_wi, k_br, k_bi = jax.random.split(key, 4)
    std = (2.0 / out_features) ** 0.5
    bound = 1.0 / (in_features ** 0.5)
    wr = std * jax.random.normal(k_wr, (out_features, in_features), jnp.float32)
    wi = std * jax.random.normal(k_wi, (out_features, in_features), jnp.float32)
    br = jax.random.uniform(k_br, (out_features,), jnp.float32, -bound, bound)
    bi = jax.random.uniform(k_bi, (out_features,), jnp.float32, -bound, bound)
    return wr, wi, br, bi


def _reference(x, wr, wi, br, bi):
    xr = jnp.real(x)
    xi = jnp.imag(x)
    real = xr @ wr.T + br - (xi @ wi.T + bi)
    imag = xi @ wr.T + br + (xr @ wi.T + bi)
    return jax.lax.complex(real, imag)


if __name__ == "__main__":
    key = jax.random.PRNGKey(0)

    # (B, in_features, out_features, compute dtype, tolerance)
    configs = [
        (10, 48, 40, jnp.float32, 1e-4),     # small, unaligned -> exercises padding
        (80, 384, 272, jnp.bfloat16, 5e-2),  # multi-tile grid (j>1, full-K tk) + bf16 MXU path
    ]

    for idx, (B, in_f, out_f, cdt, tol) in enumerate(configs):
        k_p, k_xr, k_xi = jax.random.split(jax.random.fold_in(key, idx), 3)
        wr, wi, br, bi = init_params(k_p, in_f, out_f)
        xr = jax.random.normal(k_xr, (B, in_f), jnp.float32)
        xi = jax.random.normal(k_xi, (B, in_f), jnp.float32)
        x = jax.lax.complex(xr, xi)

        ws, b_real, b_imag = prepare_params(wr, wi, br, bi, compute_dtype=cdt)
        out = complex_linear(x, ws, b_real, b_imag, out_features=out_f)
        out = jax.block_until_ready(out)

        ref = _reference(x, wr, wi, br, bi)
        assert out.shape == (B, out_f) and out.dtype == jnp.complex64
        assert jnp.allclose(jnp.real(out), jnp.real(ref), rtol=tol, atol=tol)
        assert jnp.allclose(jnp.imag(out), jnp.imag(ref), rtol=tol, atol=tol)

    print("KERNEL_OK")
</pallas_src>

<mosaic_0001>
module attributes {stable_mosaic.version = 11 : i64} {
  func.func @_complex_linear_kernel(%arg0: i32, %arg1: i32, %arg2: i32, %arg3: memref<16x128xf32, #tpu.memory_space<vmem>>, %arg4: memref<16x128xf32, #tpu.memory_space<vmem>>, %arg5: memref<2x128x128xf32, #tpu.memory_space<vmem>>, %arg6: memref<1x128xf32, #tpu.memory_space<vmem>>, %arg7: memref<1x128xf32, #tpu.memory_space<vmem>>, %arg8: memref<16x128xf32, #tpu.memory_space<vmem>>, %arg9: memref<16x128xf32, #tpu.memory_space<vmem>>, %arg10: memref<32x128xf32, #tpu.memory_space<vmem>>) attributes {dimension_semantics = [#tpu.dimension_semantics<parallel>, #tpu.dimension_semantics<parallel>, #tpu.dimension_semantics<arbitrary>], iteration_bounds = array<i64: 1, 1, 1>, scalar_prefetch = 0 : i64, scratch_operands = 1 : i64, tpu.core_type = #tpu.core_type<tc>, window_params = [{transform_indices = @transform_0, window_bounds = array<i64: 16, 128>}, {transform_indices = @transform_1, window_bounds = array<i64: 16, 128>}, {transform_indices = @transform_2, window_bounds = array<i64: 2, 128, 128>}, {transform_indices = @transform_3, window_bounds = array<i64: 1, 128>}, {transform_indices = @transform_4, window_bounds = array<i64: 1, 128>}, {transform_indices = @transform_5, window_bounds = array<i64: 16, 128>}, {transform_indices = @transform_6, window_bounds = array<i64: 16, 128>}]} {
    %c0_i32 = arith.constant 0 : i32
    %0 = arith.cmpi eq, %arg2, %c0_i32 : i32
    %1 = arith.extui %0 : i1 to i32
    %c0_i32_0 = arith.constant 0 : i32
    %2 = arith.cmpi ne, %1, %c0_i32_0 : i32
    scf.if %2 {
      %c0_31 = arith.constant 0 : index
      %c0_32 = arith.constant 0 : index
      %30 = vector.load %arg6[%c0_31, %c0_32] : memref<1x128xf32, #tpu.memory_space<vmem>>, vector<1x128xf32>
      %31 = vector.shape_cast %30 : vector<1x128xf32> to vector<1x128xf32>
      %32 = vector.broadcast %31 : vector<1x128xf32> to vector<16x128xf32>
      %c0_33 = arith.constant 0 : index
      %c0_34 = arith.constant 0 : index
      %33 = vector.load %arg8[%c0_33, %c0_34] : memref<16x128xf32, #tpu.memory_space<vmem>>, vector<16x128xf32>
      tpu.vector_store %arg8[%c0_33, %c0_34], %32 {strides = array<i32>} : memref<16x128xf32, #tpu.memory_space<vmem>>, vector<16x128xf32>,
      %c0_35 = arith.constant 0 : index
      %c0_36 = arith.constant 0 : index
      %34 = vector.load %arg7[%c0_35, %c0_36] : memref<1x128xf32, #tpu.memory_space<vmem>>, vector<1x128xf32>
      %35 = vector.shape_cast %34 : vector<1x128xf32> to vector<1x128xf32>
      %36 = vector.broadcast %35 : vector<1x128xf32> to vector<16x128xf32>
      %c0_37 = arith.constant 0 : index
      %c0_38 = arith.constant 0 : index
      %37 = vector.load %arg9[%c0_37, %c0_38] : memref<16x128xf32, #tpu.memory_space<vmem>>, vector<16x128xf32>
      tpu.vector_store %arg9[%c0_37, %c0_38], %36 {strides = array<i32>} : memref<16x128xf32, #tpu.memory_space<vmem>>, vector<16x128xf32>,
    } else {
    }
    %c0 = arith.constant 0 : index
    %c0_1 = arith.constant 0 : index
    %3 = vector.load %arg3[%c0, %c0_1] : memref<16x128xf32, #tpu.memory_space<vmem>>, vector<16x128xf32>
    %c0_2 = arith.constant 0 : index
    %c0_3 = arith.constant 0 : index
    %4 = vector.load %arg10[%c0_2, %c0_3] : memref<32x128xf32, #tpu.memory_space<vmem>>, vector<16x128xf32>
    tpu.vector_store %arg10[%c0_2, %c0_3], %3 {strides = array<i32>} : memref<32x128xf32, #tpu.memory_space<vmem>>, vector<16x128xf32>,
    %c0_4 = arith.constant 0 : index
    %c0_5 = arith.constant 0 : index
    %5 = vector.load %arg4[%c0_4, %c0_5] : memref<16x128xf32, #tpu.memory_space<vmem>>, vector<16x128xf32>
    %c16 = arith.constant 16 : index
    %c0_6 = arith.constant 0 : index
    %6 = vector.load %arg10[%c16, %c0_6] : memref<32x128xf32, #tpu.memory_space<vmem>>, vector<16x128xf32>
    tpu.vector_store %arg10[%c16, %c0_6], %5 {strides = array<i32>} : memref<32x128xf32, #tpu.memory_space<vmem>>, vector<16x128xf32>,
    %c0_7 = arith.constant 0 : index
    %c0_8 = arith.constant 0 : index
    %7 = vector.load %arg10[%c0_7, %c0_8] : memref<32x128xf32, #tpu.memory_space<vmem>>, vector<32x128xf32>
    %c0_9 = arith.constant 0 : index
    %c0_10 = arith.constant 0 : index
    %c0_11 = arith.constant 0 : index
    %8 = vector.load %arg5[%c0_9, %c0_10, %c0_11] : memref<2x128x128xf32, #tpu.memory_space<vmem>>, vector<1x128x128xf32>
    %9 = vector.shape_cast %8 : vector<1x128x128xf32> to vector<128x128xf32>
    %cst = arith.constant dense<0.000000e+00> : vector<32x128xf32>
    %10 = tpu.matmul %7, %9, %cst {dimension_numbers = #tpu.dot_dimension_numbers<[1], [0], [0], [1], [0, 0, 1, 1], [], []>} : vector<32x128xf32>, vector<128x128xf32>, vector<32x128xf32> -> vector<32x128xf32>
    %c0_12 = arith.constant 0 : index
    %c0_13 = arith.constant 0 : index
    %11 = vector.load %arg8[%c0_12, %c0_13] : memref<16x128xf32, #tpu.memory_space<vmem>>, vector<16x128xf32>
    %12 = vector.extract_strided_slice %10 {offsets = [0, 0], sizes = [16, 128], strides = [1, 1]} : vector<32x128xf32> to vector<16x128xf32>
    %13 = arith.addf %11, %12 : vector<16x128xf32>
    %c0_14 = arith.constant 0 : index
    %c0_15 = arith.constant 0 : index
    %14 = vector.load %arg8[%c0_14, %c0_15] : memref<16x128xf32, #tpu.memory_space<vmem>>, vector<16x128xf32>
    tpu.vector_store %arg8[%c0_14, %c0_15], %13 {strides = array<i32>} : memref<16x128xf32, #tpu.memory_space<vmem>>, vector<16x128xf32>,
    %c0_16 = arith.constant 0 : index
    %c0_17 = arith.constant 0 : index
    %15 = vector.load %arg9[%c0_16, %c0_17] : memref<16x128xf32, #tpu.memory_space<vmem>>, vector<16x128xf32>
    %16 = vector.extract_strided_slice %10 {offsets = [16, 0], sizes = [16, 128], strides = [1, 1]} : vector<32x128xf32> to vector<16x128xf32>
    %17 = arith.addf %15, %16 : vector<16x128xf32>
    %c0_18 = arith.constant 0 : index
    %c0_19 = arith.constant 0 : index
    %18 = vector.load %arg9[%c0_18, %c0_19] : memref<16x128xf32, #tpu.memory_space<vmem>>, vector<16x128xf32>
    tpu.vector_store %arg9[%c0_18, %c0_19], %17 {strides = array<i32>} : memref<16x128xf32, #tpu.memory_space<vmem>>, vector<16x128xf32>,
    %c1 = arith.constant 1 : index
    %c0_20 = arith.constant 0 : index
    %c0_21 = arith.constant 0 : index
    %19 = vector.load %arg5[%c1, %c0_20, %c0_21] : memref<2x128x128xf32, #tpu.memory_space<vmem>>, vector<1x128x128xf32>
    %20 = vector.shape_cast %19 : vector<1x128x128xf32> to vector<128x128xf32>
    %cst_22 = arith.constant dense<0.000000e+00> : vector<32x128xf32>
    %21 = tpu.matmul %7, %20, %cst_22 {dimension_numbers = #tpu.dot_dimension_numbers<[1], [0], [0], [1], [0, 0, 1, 1], [], []>} : vector<32x128xf32>, vector<128x128xf32>, vector<32x128xf32> -> vector<32x128xf32>
    %c0_23 = arith.constant 0 : index
    %c0_24 = arith.constant 0 : index
    %22 = vector.load %arg8[%c0_23, %c0_24] : memref<16x128xf32, #tpu.memory_space<vmem>>, vector<16x128xf32>
    %23 = vector.extract_strided_slice %21 {offsets = [16, 0], sizes = [16, 128], strides = [1, 1]} : vector<32x128xf32> to vector<16x128xf32>
    %24 = arith.subf %22, %23 : vector<16x128xf32>
    %c0_25 = arith.constant 0 : index
    %c0_26 = arith.constant 0 : index
    %25 = vector.load %arg8[%c0_25, %c0_26] : memref<16x128xf32, #tpu.memory_space<vmem>>, vector<16x128xf32>
    tpu.vector_store %arg8[%c0_25, %c0_26], %24 {strides = array<i32>} : memref<16x128xf32, #tpu.memory_space<vmem>>, vector<16x128xf32>,
    %c0_27 = arith.constant 0 : index
    %c0_28 = arith.constant 0 : index
    %26 = vector.load %arg9[%c0_27, %c0_28] : memref<16x128xf32, #tpu.memory_space<vmem>>, vector<16x128xf32>
    %27 = vector.extract_strided_slice %21 {offsets = [0, 0], sizes = [16, 128], strides = [1, 1]} : vector<32x128xf32> to vector<16x128xf32>
    %28 = arith.addf %26, %27 : vector<16x128xf32>
    %c0_29 = arith.constant 0 : index
    %c0_30 = arith.constant 0 : index
    %29 = vector.load %arg9[%c0_29, %c0_30] : memref<16x128xf32, #tpu.memory_space<vmem>>, vector<16x128xf32>
    tpu.vector_store %arg9[%c0_29, %c0_30], %28 {strides = array<i32>} : memref<16x128xf32, #tpu.memory_space<vmem>>, vector<16x128xf32>,
    return
  }
  func.func @transform_0(%arg0: i32, %arg1: i32, %arg2: i32) -> (i32, i32) {
    %c0_i32 = arith.constant 0 : i32
    return %arg0, %arg2 : i32, i32
  }
  func.func @transform_1(%arg0: i32, %arg1: i32, %arg2: i32) -> (i32, i32) {
    %c0_i32 = arith.constant 0 : i32
    return %arg0, %arg2 : i32, i32
  }
  func.func @transform_2(%arg0: i32, %arg1: i32, %arg2: i32) -> (i32, i32, i32) {
    %c0_i32 = arith.constant 0 : i32
    %c0_i32_0 = arith.constant 0 : i32
    return %c0_i32, %arg2, %arg1 : i32, i32, i32
  }
  func.func @transform_3(%arg0: i32, %arg1: i32, %arg2: i32) -> (i32, i32) {
    %c0_i32 = arith.constant 0 : i32
    %c0_i32_0 = arith.constant 0 : i32
    return %c0_i32, %arg1 : i32, i32
  }
  func.func @transform_4(%arg0: i32, %arg1: i32, %arg2: i32) -> (i32, i32) {
    %c0_i32 = arith.constant 0 : i32
    %c0_i32_0 = arith.constant 0 : i32
    return %c0_i32, %arg1 : i32, i32
  }
  func.func @transform_5(%arg0: i32, %arg1: i32, %arg2: i32) -> (i32, i32) {
    %c0_i32 = arith.constant 0 : i32
    return %arg0, %arg1 : i32, i32
  }
  func.func @transform_6(%arg0: i32, %arg1: i32, %arg2: i32) -> (i32, i32) {
    %c0_i32 = arith.constant 0 : i32
    return %arg0, %arg1 : i32, i32
  }
}

</mosaic_0001>

<bundles_post_ra>
// kernel: complex_linear_planar.1
= control target key start
LH: loop header
LB: loop body
LE: loop exit
PB: predicated region body
PF: predicated region fallthrough
CT: control target
= control target key end

     0   :  { %12 = vsyncpa [#allocation4], 0  ;;  %s413_s0 = inlined_call_operand.vmem [shape: f32[16,128], index: 0, kind: input, shape index: {}]   ;;  %s414_s1 = inlined_call_operand.vmem [shape: f32[16,128], index: 1, kind: input, shape index: {}]   ;;  %s415_s2 = inlined_call_operand.hbm [shape: f32[2,128,128], index: 2, kind: input, shape index: {}]   ;;  %s416_s3 = inlined_call_operand.vmem [shape: f32[1,128], index: 3, kind: input, shape index: {}]   ;;  %s417_s4 = inlined_call_operand.vmem [shape: f32[1,128], index: 4, kind: input, shape index: {}]   ;;  %s418_s5 = inlined_call_operand.hbm [shape: f32[16,128], index: 5, kind: output, shape index: {0}]   ;;  %s419_s6 = inlined_call_operand.hbm [shape: f32[16,128], index: 6, kind: output, shape index: {1}]  }
   0x1   :  { %13 = vsyncpa [#allocation5], 0 }
   0x2   :  { %14 = vsyncpa [#allocation8], 0  ;;  %s23_s23 = sshll.u32 %s415_s2, 4  ;;  %s337_s24 = smov [#allocation3]   ;;  %s24_s23 = int_to_ptr.hbm [resolvable:$true] %s23_s23 }
   0x3   :  { %s25_s25 = sshll.u32 %s337_s24, 4  ;;  %s338_s26 = smov 128   ;;  %s26_s25 = int_to_ptr.vmem [resolvable:$true] %s25_s25 }
   0x4   :  { %s339_s27 = smov 8  }
   0x5   :  { %31 = dma.hbm_to_vmem [thread:$0]  %s24_s23, 4096, %s26_s25, [#allocation4], %s338_s26, %s338_s26, %s339_s27  }
   0x6   :  { %331 = dma.done.wait [#allocation4], 4096  }
   0x7   :  { %332 = vsyncadd [#allocation4], 4294963200  ;;  %v83_v0 = vld [vmem:[#allocation3 + $0x78] sm:$0xff]  ;;  %v82_v1 = vld [vmem:[#allocation3 + $0x70] sm:$0xff]  ;;  %s202_s16 = sshll.u32 %s419_s6, 4  ;;  %s189_s20 = sshll.u32 %s418_s5, 4  ;;  %s203_s16 = int_to_ptr.hbm [resolvable:$true] %s202_s16  ;;  %s190_s20 = int_to_ptr.hbm [resolvable:$true] %s189_s20 }
   0x8   :  { %220 = vmatpush.msra.mxu2 %v83_v0  ;;  %84 = vmatpush.msra.mxu0 %v83_v0  ;;  %v81_v2 = vld [vmem:[#allocation3 + $0x68] sm:$0xff]  ;;  %v141_v3 = vld [vmem:[#allocation3 + $0xf8] sm:$0xff]  ;;  %v140_v4 = vld [vmem:[#allocation3 + $0xf0] sm:$0xff] }
   0x9   :  { %v80_v5 = vld [vmem:[#allocation3 + $0x60] sm:$0xff]  ;;  %236 = vmatpush.msra.mxu3 %v141_v3  ;;  %142 = vmatpush.msra.mxu1 %v141_v3  ;;  %v139_v6 = vld [vmem:[#allocation3 + $0xe8] sm:$0xff]  ;;  %v79_v7 = vld [vmem:[#allocation3 + $0x58] sm:$0xff] }
   0xa   :  { %221 = vmatpush.msra.mxu2 %v82_v1  ;;  %85 = vmatpush.msra.mxu0 %v82_v1  ;;  %v138_v8 = vld [vmem:[#allocation3 + $0xe0] sm:$0xff]  ;;  %v78_v9 = vld [vmem:[#allocation3 + $0x50] sm:$0xff]  ;;  %v137_v10 = vld [vmem:[#allocation3 + $0xd8] sm:$0xff] }
   0xb   :  { %237 = vmatpush.msra.mxu3 %v140_v4  ;;  %143 = vmatpush.msra.mxu1 %v140_v4  ;;  %v77_v11 = vld [vmem:[#allocation3 + $0x48] sm:$0xff]  ;;  %v136_v12 = vld [vmem:[#allocation3 + $0xd0] sm:$0xff]  ;;  %v76_v13 = vld [vmem:[#allocation3 + $0x40] sm:$0xff] }
   0xc   :  { %222 = vmatpush.msra.mxu2 %v81_v2  ;;  %86 = vmatpush.msra.mxu0 %v81_v2  ;;  %v135_v14 = vld [vmem:[#allocation3 + $0xc8] sm:$0xff]  ;;  %v75_v15 = vld [vmem:[#allocation3 + $0x38] sm:$0xff]  ;;  %v134_v16 = vld [vmem:[#allocation3 + $0xc0] sm:$0xff] }
   0xd   :  { %238 = vmatpush.msra.mxu3 %v139_v6  ;;  %144 = vmatpush.msra.mxu1 %v139_v6  ;;  %v74_v17 = vld [vmem:[#allocation3 + $0x30] sm:$0xff]  ;;  %v133_v18 = vld [vmem:[#allocation3 + $0xb8] sm:$0xff]  ;;  %v73_v19 = vld [vmem:[#allocation3 + $0x28] sm:$0xff] }
   0xe   :  { %223 = vmatpush.msra.mxu2 %v80_v5  ;;  %87 = vmatpush.msra.mxu0 %v80_v5  ;;  %v132_v20 = vld [vmem:[#allocation3 + $0xb0] sm:$0xff]  ;;  %v72_v21 = vld [vmem:[#allocation3 + $0x20] sm:$0xff]  ;;  %v131_v22 = vld [vmem:[#allocation3 + $0xa8] sm:$0xff] }
   0xf   :  { %239 = vmatpush.msra.mxu3 %v138_v8  ;;  %145 = vmatpush.msra.mxu1 %v138_v8  ;;  %v71_v23 = vld [vmem:[#allocation3 + $0x18] sm:$0xff]  ;;  %v130_v24 = vld [vmem:[#allocation3 + $0xa0] sm:$0xff]  ;;  %v70_v25 = vld [vmem:[#allocation3 + $0x10] sm:$0xff] }
  0x10   :  { %224 = vmatpush.msra.mxu2 %v79_v7  ;;  %88 = vmatpush.msra.mxu0 %v79_v7  ;;  %v129_v26 = vld [vmem:[#allocation3 + $0x98] sm:$0xff]  ;;  %v69_v27 = vld [vmem:[#allocation3 + $0x8] sm:$0xff]  ;;  %v128_v28 = vld [vmem:[#allocation3 + $0x90] sm:$0xff] }
  0x11   :  { %240 = vmatpush.msra.mxu3 %v137_v10  ;;  %146 = vmatpush.msra.mxu1 %v137_v10  ;;  %v68_v29 = vld [vmem:[#allocation3] sm:$0xff]  ;;  %v127_v32 = vld [vmem:[#allocation3 + $0x88] sm:$0xff] }
  0x12   :  { %225 = vmatpush.msra.mxu2 %v78_v9  ;;  %89 = vmatpush.msra.mxu0 %v78_v9  ;;  %v60_v30 = vld [vmem:[%s414_s1] sm:$0xff]  ;;  %v61_v34 = vld [vmem:[%s414_s1 + $0x8] sm:$0xff] }
  0x13   :  { %241 = vmatpush.msra.mxu3 %v136_v12  ;;  %147 = vmatpush.msra.mxu1 %v136_v12  ;;  %v56_v31 = vld [vmem:[%s413_s0] sm:$0xff]  ;;  %v57_v35 = vld [vmem:[%s413_s0 + $0x8] sm:$0xff]  ;;  %s340_s0 = smov [#allocation7]  }
  0x14   :  { %226 = vmatpush.msra.mxu2 %v77_v11  ;;  %90 = vmatpush.msra.mxu0 %v77_v11  ;;  %v126_v33 = vld [vmem:[#allocation3 + $0x80] sm:$0xff]  ;;  %s200_s1 = sshll.u32 %s340_s0, 4  ;;  %s201_s1 = int_to_ptr.vmem [resolvable:$true] %s200_s1 }
  0x15   :  { %242 = vmatpush.msra.mxu3 %v135_v14  ;;  %148 = vmatpush.msra.mxu1 %v135_v14  ;;  %v257_v37 = vld [vmem:[%s416_s3] ss:$0 sm:$0xff] }
  0x16   :  { %227 = vmatpush.msra.mxu2 %v76_v13  ;;  %91 = vmatpush.msra.mxu0 %v76_v13  ;;  %v258_v38 = vld [vmem:[%s417_s4] ss:$0 sm:$0xff]  ;;  %s341_s4 = smov [#allocation6]  }
  0x17   :  { %243 = vmatpush.msra.mxu3 %v134_v16  ;;  %149 = vmatpush.msra.mxu1 %v134_v16  ;;  %s187_s17 = sshll.u32 %s341_s4, 4  ;;  %s188_s17 = int_to_ptr.vmem [resolvable:$true] %s187_s17 }
  0x18   :  { %228 = vmatpush.msra.mxu2 %v75_v15  ;;  %92 = vmatpush.msra.mxu0 %v75_v15 }
  0x19   :  { %244 = vmatpush.msra.mxu3 %v133_v18  ;;  %150 = vmatpush.msra.mxu1 %v133_v18 }
  0x1a   :  { %229 = vmatpush.msra.mxu2 %v74_v17  ;;  %93 = vmatpush.msra.mxu0 %v74_v17 }
  0x1b   :  { %245 = vmatpush.msra.mxu3 %v132_v20  ;;  %151 = vmatpush.msra.mxu1 %v132_v20 }
  0x1c   :  { %230 = vmatpush.msra.mxu2 %v73_v19  ;;  %94 = vmatpush.msra.mxu0 %v73_v19 }
  0x1d   :  { %246 = vmatpush.msra.mxu3 %v131_v22  ;;  %152 = vmatpush.msra.mxu1 %v131_v22 }
  0x1e   :  { %231 = vmatpush.msra.mxu2 %v72_v21  ;;  %95 = vmatpush.msra.mxu0 %v72_v21 }
  0x1f   :  { %247 = vmatpush.msra.mxu3 %v130_v24  ;;  %153 = vmatpush.msra.mxu1 %v130_v24 }
  0x20   :  { %232 = vmatpush.msra.mxu2 %v71_v23  ;;  %96 = vmatpush.msra.mxu0 %v71_v23 }
  0x21   :  { %248 = vmatpush.msra.mxu3 %v129_v26  ;;  %154 = vmatpush.msra.mxu1 %v129_v26 }
  0x22   :  { %233 = vmatpush.msra.mxu2 %v70_v25  ;;  %97 = vmatpush.msra.mxu0 %v70_v25 }
  0x23   :  { %249 = vmatpush.msra.mxu3 %v128_v28  ;;  %155 = vmatpush.msra.mxu1 %v128_v28 }
  0x24   :  { %234 = vmatpush.msra.mxu2 %v69_v27  ;;  %98 = vmatpush.msra.mxu0 %v69_v27 }
  0x25   :  { %250 = vmatpush.msra.mxu3 %v127_v32  ;;  %156 = vmatpush.msra.mxu1 %v127_v32 }
  0x26   :  { %235 = vmatpush.msra.mxu2 %v68_v29  ;;  %99 = vmatpush.msra.mxu0 %v68_v29 }
  0x27   :  { %106 = vmatmul.f32.vlgmr.msra.gmra.mxu2 %v60_v30  ;;  %100 = vmatmul.f32.vlgmr.msra.gmra.mxu0 %v56_v31 }
  0x28   :  { %251 = vmatpush.msra.mxu3 %v126_v33  ;;  %157 = vmatpush.msra.mxu1 %v126_v33 }
  0x29   :  { %164 = vmatmul.f32.vlgmr.msra.gmra.mxu3 %v60_v30  ;;  %158 = vmatmul.f32.vlgmr.msra.gmra.mxu1 %v56_v31 }
  0x2f   :  { %109 = vmatmul.f32.gmra.mxu2 %v61_v34  ;;  %103 = vmatmul.f32.gmra.mxu0 %v57_v35 }
  0x31   :  { %167 = vmatmul.f32.gmra.mxu3 %v61_v34  ;;  %161 = vmatmul.f32.gmra.mxu1 %v57_v35 }
  0xa4   :  { %v101_v36 = vpop.f32.mrf.mxu0 }
  0xa5   :  { %v115_v41 = vadd.f32 %v257_v37, %v101_v36 }
  0xa6   :  { %v159_v39 = vpop.f32.mrf.mxu1 }
  0xaa   :  { %v107_v40 = vpop.f32.mrf.mxu2 }
  0xab   :  { %v121_v42 = vadd.f32 %v258_v38, %v107_v40 }
  0xac   :  { %v165_v44 = vpop.f32.mrf.mxu3  ;;  %v104_v46 = vpop.f32.mrf.mxu0 }
  0xad   :  { %v179_v43 = vadd.f32 %v159_v39, %v121_v42  ;;  %v173_v45 = vsub.f32 %v115_v41, %v165_v44  ;;  %v116_v49 = vadd.f32 %v257_v37, %v104_v46 }
  0xae   :  { %v162_v48 = vpop.f32.mrf.mxu1 }
  0xaf   :  { %181 = vst [vmem:[#allocation7] sm:$0xff] %v179_v43 }
  0xb0   :  { %175 = vst [vmem:[#allocation6] sm:$0xff] %v173_v45 }
  0xb2   :  { %v110_v47 = vpop.f32.mrf.mxu2 }
  0xb3   :  { %v122_v50 = vadd.f32 %v258_v38, %v110_v47 }
  0xb4   :  { %v168_v52 = vpop.f32.mrf.mxu3 }
  0xb5   :  { %v180_v51 = vadd.f32 %v162_v48, %v122_v50  ;;  %v174_v53 = vsub.f32 %v116_v49, %v168_v52 }
  0xb7   :  { %182 = vst [vmem:[#allocation7 + $0x8] sm:$0xff] %v180_v51 }
  0xb8   :  { %208 = dma.vmem_to_hbm [thread:$0]  %s201_s1, 256, %s203_s16, [#allocation8], %s338_s26, %s338_s26, %s339_s27   ;;  %176 = vst [vmem:[#allocation6 + $0x8] sm:$0xff] %v174_v53 }
  0xb9   :  { %195 = dma.vmem_to_hbm [thread:$0]  %s188_s17, 256, %s190_s20, [#allocation5], %s338_s26, %s338_s26, %s339_s27  }
  0xba   :  { %333 = dma.done.wait [#allocation5], 256  }
  0xbb   :  { %334 = vsyncadd [#allocation5], 4294967040 }
  0xbc   :  { %335 = dma.done.wait [#allocation8], 256  }
  0xbd   :  { %336 = vsyncadd [#allocation8], 4294967040 }
  0xbe   :  { %217 = vsyncpa [#allocation4], 1 }
  0xbf   :  { %218 = vsyncpa [#allocation5], 1 }
  0xc0   :  { %219 = vsyncpa [#allocation8], 1 }

</bundles_post_ra>
